<compile_context>
chip_gen: v5e
topology: v5e:2x2
jax: 0.10.0
libtpu: 0.0.40
codegen_flags: <defaults>
</compile_context>

<pallas_src>
import functools

import jax
import jax.numpy as jnp
from jax.experimental import pallas as pl
from jax.experimental.pallas import tpu as pltpu

# ----------------------------- views -----------------------------------------
LCC, RCC, LMLO, RMLO = "L-CC", "R-CC", "L-MLO", "R-MLO"
VIEWS_LIST = [LCC, RCC, LMLO, RMLO]
# view -> which backbone's parameters (matches model_dict in the PyTorch code)
VIEW_TO_BACKBONE = {LMLO: "cc", RMLO: "cc", LCC: "mlo", RCC: "mlo"}
# backbone -> the two views it processes (merged into one pallas_call each)
BACKBONE_TO_VIEWS = {"cc": (LMLO, RMLO), "mlo": (LCC, RCC)}

# Rows of conv output produced per grid step.  Size so that
#   2 (double buffer) * Bb * (TILE_H + 2) * W * 3C * 2 bytes   (+ activations)
# stays a few MiB under vmem_limit_bytes; re-derive for v7x (64 MiB VMEM/TC).
TILE_H = 8


# ----------------------------- Pallas kernel ---------------------------------
def fused_backbone_kernel(tiles_ref, cw_ref, cb_ref, fw_ref, fb_ref,
                          out_ref, acc_ref, *, tile_h, width, inv_hw):
    """One row-tile of:  conv3x3 (as matmul) + bias + ReLU + pooled partial sum.
    On the last row-tile: mean + FC + bias -> logits.

    tiles_ref : [Bb, (tile_h+2)*W, 3*C]  bf16  halo row-tile, width-unrolled
    cw_ref    : [9*C, F]                 bf16  conv weight ((di,dj,c) major->minor)
    cb_ref    : [1, F]                   f32   conv bias
    fw_ref    : [F, NC]                  f32   fc weight
    fb_ref    : [1, NC]                  f32   fc bias
    out_ref   : [Bb, NC]                 f32   logits (written on last step only)
    acc_ref   : [Bb, F]                  f32   running pooled sum (VMEM scratch)
    """
    t = pl.program_id(1)

    @pl.when(t == 0)
    def _init():
        acc_ref[...] = jnp.zeros_like(acc_ref)

    bb = acc_ref.shape[0]
    s_out = tile_h * width

    # ---- in-VMEM im2col over the row direction (3 shifted views per image) ----
    # Shifting by `di` rows == shifting by di*width in the flattened (row, col)
    # spatial index; offsets are multiples of 8 -> aligned sublane slices.
    per_batch = []
    for j in range(bb):                                   # static, tiny
        xj = tiles_ref[j]                                 # [(tile_h+2)*W, 3C] bf16
        shifts = [xj[di * width: di * width + s_out, :].astype(jnp.float32)
                  for di in range(3)]
        per_batch.append(jnp.concatenate(shifts, axis=1))  # [s_out, 9C] f32
    patches = jnp.concatenate(per_batch, axis=0)           # [bb*s_out, 9C]

    # ---- conv as ONE long-M MXU matmul (bf16 inputs, f32 accumulation) -------
    conv = jnp.dot(patches.astype(jnp.bfloat16), cw_ref[...],
                   preferred_element_type=jnp.float32)     # [bb*s_out, F]
    act = jnp.maximum(conv + cb_ref[...], 0.0)             # bias + ReLU (f32, VPU)

    # ---- pooled partial sums into the resident accumulator -------------------
    parts = [jnp.sum(act[j * s_out:(j + 1) * s_out, :], axis=0, keepdims=True)
             for j in range(bb)]
    acc_ref[...] += jnp.concatenate(parts, axis=0)         # [bb, F]

    # ---- finalize on the last row-tile ---------------------------------------
    @pl.when(t == pl.num_programs(1) - 1)
    def _fin():
        pooled = acc_ref[...] * inv_hw                     # global average pool
        logits = jnp.dot(pooled, fw_ref[...],
                         preferred_element_type=jnp.float32) + fb_ref[...]
        out_ref[...] = logits.astype(out_ref.dtype)


# ----------------------------- wrapper ---------------------------------------
@functools.partial(jax.jit, static_argnames=("num_classes", "tile_h"))
def fused_backbone_forward(x_nchw, p, num_classes, tile_h=TILE_H):
    """x_nchw: [B2, C, H, W] (two merged views). p: torch-layout params."""
    B2, C, H, W = x_nchw.shape
    F = p["conv_b"].shape[0]

    if H % tile_h != 0:
        # TODO(synk): support ragged H via a masked final tile; for now fall
        # back to a single (un-tiled) row block, which is still correct.
        tile_h = H
    nt = H // tile_h
    g = 2 if B2 % 2 == 0 else 1          # batch groups (parallel axis for v7x)
    bb = B2 // g
    s_in = (tile_h + 2) * W

    # NCHW -> NHWC, zero-pad spatially.
    x = jnp.transpose(x_nchw, (0, 2, 3, 1))
    xp = jnp.pad(x, ((0, 0), (1, 1), (1, 1), (0, 0)))          # [B2, H+2, W+2, C]
    # Host unrolls only the WIDTH direction (3x, vs 9x for full im2col); the
    # height direction is unrolled inside the kernel from halo row-tiles.
    x3 = jnp.concatenate([xp[:, :, j:j + W, :] for j in range(3)], axis=-1)
    x3 = x3.astype(jnp.bfloat16)                               # [B2, H+2, W, 3C]
    # Halo row-tiles: tile t holds padded rows [t*tile_h, t*tile_h + tile_h + 2).
    tiles = jnp.stack(
        [x3[:, t * tile_h: t * tile_h + tile_h + 2] for t in range(nt)], axis=0)
    tiles = tiles.reshape(nt, B2, s_in, 3 * C)                 # [NT, B2, S_in, 3C]

    # Kernel-layout weights.  K index = (di*3 + dj)*C + c  matches the in-kernel
    # patch assembly (row-offset major, then width-offset, then channel).
    cw = jnp.transpose(p["conv_w"], (2, 3, 1, 0)).reshape(9 * C, F).astype(jnp.bfloat16)
    cb = p["conv_b"].reshape(1, F).astype(jnp.float32)
    fw = p["fc_w"].T.astype(jnp.float32)                       # [F, NC]
    fb = p["fc_b"].reshape(1, num_classes).astype(jnp.float32)

    kernel = functools.partial(fused_backbone_kernel, tile_h=tile_h, width=W,
                               inv_hw=1.0 / float(H * W))

    flops = 2 * B2 * H * W * (9 * C) * F + 2 * B2 * F * num_classes
    bytes_accessed = (tiles.size * tiles.dtype.itemsize
                      + cw.size * cw.dtype.itemsize
                      + cb.size * 4 + fw.size * 4 + fb.size * 4
                      + B2 * num_classes * 4)

    out = pl.pallas_call(
        kernel,
        out_shape=jax.ShapeDtypeStruct((g, bb, num_classes), jnp.float32),
        grid_spec=pltpu.PrefetchScalarGridSpec(
            num_scalar_prefetch=0,
            grid=(g, nt),                                      # (batch groups, row tiles)
            in_specs=[
                pl.BlockSpec((None, bb, s_in, 3 * C), lambda gi, ti: (ti, gi, 0, 0)),
                pl.BlockSpec((9 * C, F), lambda gi, ti: (0, 0)),
                pl.BlockSpec((1, F), lambda gi, ti: (0, 0)),
                pl.BlockSpec((F, num_classes), lambda gi, ti: (0, 0)),
                pl.BlockSpec((1, num_classes), lambda gi, ti: (0, 0)),
            ],
            out_specs=pl.BlockSpec((None, bb, num_classes), lambda gi, ti: (gi, 0, 0)),
            scratch_shapes=[pltpu.VMEM((bb, F), jnp.float32)],
        ),
        compiler_params=pltpu.CompilerParams(
            dimension_semantics=("parallel", "arbitrary"),
            vmem_limit_bytes=32 * 1024 * 1024,
        ),
        cost_estimate=pl.CostEstimate(flops=flops, transcendentals=0,
                                      bytes_accessed=bytes_accessed),
    )(tiles, cw, cb, fw, fb)

    return out.reshape(B2, num_classes)


# ----------------------------- model -----------------------------------------
def init_backbone_params(key, input_channels, feat, num_classes):
    """Deterministic synthetic backbone parameters, kept in PyTorch layouts."""
    k1, k2, k3, k4 = jax.random.split(key, 4)
    return {
        "conv_w": jax.random.normal(k1, (feat, input_channels, 3, 3), jnp.float32) * 0.1,
        "conv_b": jax.random.normal(k2, (feat,), jnp.float32) * 0.1,
        "fc_w":   jax.random.normal(k3, (num_classes, feat), jnp.float32) * 0.1,
        "fc_b":   jax.random.normal(k4, (num_classes,), jnp.float32) * 0.1,
    }


class FourViewModelPallas:
    """JAX/Pallas equivalent of FourViewModel.forward."""

    def __init__(self, input_channels, num_classes, feat=128, seed=0):
        # feat=128 keeps the conv-output / accumulator lane dimension dense.
        self.num_classes = num_classes
        key = jax.random.PRNGKey(seed)
        kcc, kmlo = jax.random.split(key)
        self.params = {
            "cc": init_backbone_params(kcc, input_channels, feat, num_classes),
            "mlo": init_backbone_params(kmlo, input_channels, feat, num_classes),
        }

    def __call__(self, x_dict):
        out = {}
        # The two views that share a backbone are merged into a single call.
        for backbone, (va, vb) in BACKBONE_TO_VIEWS.items():
            xa, xb = x_dict[va], x_dict[vb]
            B = xa.shape[0]
            merged = jnp.concatenate([xa, xb], axis=0)
            logits = fused_backbone_forward(merged, self.params[backbone],
                                            num_classes=self.num_classes)
            out[va], out[vb] = logits[:B], logits[B:]
        return {view: out[view] for view in VIEWS_LIST}


# ---------------------- pure-JAX reference (independent path) ----------------
def backbone_ref(x_nchw, p):
    """Conv3x3(pad=1) + bias + ReLU + GAP + Linear, with the same bf16 input
    quantization the kernel applies to the conv operands."""
    hp = jax.lax.Precision.HIGHEST
    xq = x_nchw.astype(jnp.bfloat16).astype(jnp.float32)
    wq = p["conv_w"].astype(jnp.bfloat16).astype(jnp.float32)
    y = jax.lax.conv_general_dilated(
        xq, wq, window_strides=(1, 1), padding="SAME",
        dimension_numbers=("NCHW", "OIHW", "NCHW"), precision=hp)
    y = jnp.maximum(y + p["conv_b"][None, :, None, None], 0.0)
    pooled = jnp.mean(y, axis=(2, 3))
    return jnp.dot(pooled, p["fc_w"].T, precision=hp) + p["fc_b"][None, :]


if __name__ == "__main__":
    B, C_in, H, W = 2, 4, 16, 16
    NUM_CLASSES = 4

    model = FourViewModelPallas(input_channels=C_in, num_classes=NUM_CLASSES, seed=0)

    key = jax.random.PRNGKey(0)
    keys = jax.random.split(key, len(VIEWS_LIST))
    x_dict = {view: jax.random.normal(k, (B, C_in, H, W), jnp.float32)
              for view, k in zip(VIEWS_LIST, keys)}

    h_dict = model(x_dict)
    jax.block_until_ready(h_dict)

    # sanity check against an independent pure-JAX reference
    for view in VIEWS_LIST:
        ref = backbone_ref(x_dict[view], model.params[VIEW_TO_BACKBONE[view]])
        assert h_dict[view].shape == (B, NUM_CLASSES)
        assert jnp.allclose(h_dict[view], ref, atol=1e-3, rtol=1e-3), view

    print("KERNEL_OK")
</pallas_src>

<mosaic_0001>
module attributes {stable_mosaic.version = 11 : i64} {
  func.func @fused_backbone_kernel(%arg0: i32, %arg1: i32, %arg2: memref<1x2x160x12xbf16, #tpu.memory_space<vmem>>, %arg3: memref<36x128xbf16, #tpu.memory_space<vmem>>, %arg4: memref<1x128xf32, #tpu.memory_space<vmem>>, %arg5: memref<128x4xf32, #tpu.memory_space<vmem>>, %arg6: memref<1x4xf32, #tpu.memory_space<vmem>>, %arg7: memref<1x2x4xf32, #tpu.memory_space<vmem>>, %arg8: memref<2x128xf32, #tpu.memory_space<vmem>>) attributes {dimension_semantics = [#tpu.dimension_semantics<parallel>, #tpu.dimension_semantics<arbitrary>], iteration_bounds = array<i64: 2, 2>, scalar_prefetch = 0 : i64, scratch_operands = 1 : i64, tpu.core_type = #tpu.core_type<tc>, window_params = [{transform_indices = @transform_0, window_bounds = array<i64: 1, 2, 160, 12>}, {pipeline_mode = #tpu.pipeline_mode<synchronous>, transform_indices = @transform_1, window_bounds = array<i64: 36, 128>}, {pipeline_mode = #tpu.pipeline_mode<synchronous>, transform_indices = @transform_2, window_bounds = array<i64: 1, 128>}, {pipeline_mode = #tpu.pipeline_mode<synchronous>, transform_indices = @transform_3, window_bounds = array<i64: 128, 4>}, {pipeline_mode = #tpu.pipeline_mode<synchronous>, transform_indices = @transform_4, window_bounds = array<i64: 1, 4>}, {transform_indices = @transform_5, window_bounds = array<i64: 1, 2, 4>}]} {
    %c0_i32 = arith.constant 0 : i32
    %0 = arith.cmpi eq, %arg1, %c0_i32 : i32
    %1 = arith.extui %0 : i1 to i32
    %c0_i32_0 = arith.constant 0 : i32
    %2 = arith.cmpi ne, %1, %c0_i32_0 : i32
    scf.if %2 {
      %cst_19 = arith.constant 0.000000e+00 : f32
      %43 = vector.broadcast %cst_19 : f32 to vector<2x128xf32>
      %c0_20 = arith.constant 0 : index
      %c0_21 = arith.constant 0 : index
      %44 = vector.load %arg8[%c0_20, %c0_21] : memref<2x128xf32, #tpu.memory_space<vmem>>, vector<2x128xf32>
      tpu.vector_store %arg8[%c0_20, %c0_21], %43 {strides = array<i32>} : memref<2x128xf32, #tpu.memory_space<vmem>>, vector<2x128xf32>,
    } else {
    }
    %c0 = arith.constant 0 : index
    %c0_1 = arith.constant 0 : index
    %c0_2 = arith.constant 0 : index
    %c0_3 = arith.constant 0 : index
    %3 = vector.load %arg2[%c0, %c0_1, %c0_2, %c0_3] : memref<1x2x160x12xbf16, #tpu.memory_space<vmem>>, vector<1x1x160x12xbf16>
    %4 = vector.shape_cast %3 : vector<1x1x160x12xbf16> to vector<160x12xbf16>
    %5 = vector.extract_strided_slice %4 {offsets = [0, 0], sizes = [128, 12], strides = [1, 1]} : vector<160x12xbf16> to vector<128x12xbf16>
    %6 = arith.extf %5 : vector<128x12xbf16> to vector<128x12xf32>
    %7 = vector.extract_strided_slice %4 {offsets = [16, 0], sizes = [128, 12], strides = [1, 1]} : vector<160x12xbf16> to vector<128x12xbf16>
    %8 = arith.extf %7 : vector<128x12xbf16> to vector<128x12xf32>
    %9 = vector.extract_strided_slice %4 {offsets = [32, 0], sizes = [128, 12], strides = [1, 1]} : vector<160x12xbf16> to vector<128x12xbf16>
    %10 = arith.extf %9 : vector<128x12xbf16> to vector<128x12xf32>
    %11 = tpu.concatenate %6, %8, %10 in 1 : vector<128x12xf32>, vector<128x12xf32>, vector<128x12xf32> -> vector<128x36xf32>
    %c0_4 = arith.constant 0 : index
    %c1 = arith.constant 1 : index
    %c0_5 = arith.constant 0 : index
    %c0_6 = arith.constant 0 : index
    %12 = vector.load %arg2[%c0_4, %c1, %c0_5, %c0_6] : memref<1x2x160x12xbf16, #tpu.memory_space<vmem>>, vector<1x1x160x12xbf16>
    %13 = vector.shape_cast %12 : vector<1x1x160x12xbf16> to vector<160x12xbf16>
    %14 = vector.extract_strided_slice %13 {offsets = [0, 0], sizes = [128, 12], strides = [1, 1]} : vector<160x12xbf16> to vector<128x12xbf16>
    %15 = arith.extf %14 : vector<128x12xbf16> to vector<128x12xf32>
    %16 = vector.extract_strided_slice %13 {offsets = [16, 0], sizes = [128, 12], strides = [1, 1]} : vector<160x12xbf16> to vector<128x12xbf16>
    %17 = arith.extf %16 : vector<128x12xbf16> to vector<128x12xf32>
    %18 = vector.extract_strided_slice %13 {offsets = [32, 0], sizes = [128, 12], strides = [1, 1]} : vector<160x12xbf16> to vector<128x12xbf16>
    %19 = arith.extf %18 : vector<128x12xbf16> to vector<128x12xf32>
    %20 = tpu.concatenate %15, %17, %19 in 1 : vector<128x12xf32>, vector<128x12xf32>, vector<128x12xf32> -> vector<128x36xf32>
    %21 = tpu.concatenate %11, %20 in 0 : vector<128x36xf32>, vector<128x36xf32> -> vector<256x36xf32>
    %22 = arith.truncf %21 : vector<256x36xf32> to vector<256x36xbf16>
    %c0_7 = arith.constant 0 : index
    %c0_8 = arith.constant 0 : index
    %23 = vector.load %arg3[%c0_7, %c0_8] : memref<36x128xbf16, #tpu.memory_space<vmem>>, vector<36x128xbf16>
    %cst = arith.constant dense<0.000000e+00> : vector<256x128xf32>
    %24 = tpu.matmul %22, %23, %cst {dimension_numbers = #tpu.dot_dimension_numbers<[1], [0], [0], [1], [0, 0, 1, 1], [], []>} : vector<256x36xbf16>, vector<36x128xbf16>, vector<256x128xf32> -> vector<256x128xf32>
    %c0_9 = arith.constant 0 : index
    %c0_10 = arith.constant 0 : index
    %25 = vector.load %arg4[%c0_9, %c0_10] : memref<1x128xf32, #tpu.memory_space<vmem>>, vector<1x128xf32>
    %26 = vector.broadcast %25 : vector<1x128xf32> to vector<256x128xf32>
    %27 = arith.addf %24, %26 : vector<256x128xf32>
    %cst_11 = arith.constant 0.000000e+00 : f32
    %28 = vector.broadcast %cst_11 : f32 to vector<256x128xf32>
    %29 = arith.maximumf %27, %28 : vector<256x128xf32>
    %30 = vector.extract_strided_slice %29 {offsets = [0, 0], sizes = [128, 128], strides = [1, 1]} : vector<256x128xf32> to vector<128x128xf32>
    %cst_12 = arith.constant dense<0.000000e+00> : vector<128xf32>
    %31 = vector.multi_reduction <add>, %30, %cst_12 [0] : vector<128x128xf32> to vector<128xf32>
    %32 = vector.shape_cast %31 : vector<128xf32> to vector<1x128xf32>
    %33 = vector.extract_strided_slice %29 {offsets = [128, 0], sizes = [128, 128], strides = [1, 1]} : vector<256x128xf32> to vector<128x128xf32>
    %cst_13 = arith.constant dense<0.000000e+00> : vector<128xf32>
    %34 = vector.multi_reduction <add>, %33, %cst_13 [0] : vector<128x128xf32> to vector<128xf32>
    %35 = vector.shape_cast %34 : vector<128xf32> to vector<1x128xf32>
    %c0_14 = arith.constant 0 : index
    %c0_15 = arith.constant 0 : index
    %36 = vector.load %arg8[%c0_14, %c0_15] : memref<2x128xf32, #tpu.memory_space<vmem>>, vector<2x128xf32>
    %37 = tpu.concatenate %32, %35 in 0 : vector<1x128xf32>, vector<1x128xf32> -> vector<2x128xf32>
    %38 = arith.addf %36, %37 : vector<2x128xf32>
    %c0_16 = arith.constant 0 : index
    %c0_17 = arith.constant 0 : index
    %39 = vector.load %arg8[%c0_16, %c0_17] : memref<2x128xf32, #tpu.memory_space<vmem>>, vector<2x128xf32>
    tpu.vector_store %arg8[%c0_16, %c0_17], %38 {strides = array<i32>} : memref<2x128xf32, #tpu.memory_space<vmem>>, vector<2x128xf32>,
    %c1_i32 = arith.constant 1 : i32
    %40 = arith.cmpi eq, %arg1, %c1_i32 : i32
    %41 = arith.extui %40 : i1 to i32
    %c0_i32_18 = arith.constant 0 : i32
    %42 = arith.cmpi ne, %41, %c0_i32_18 : i32
    scf.if %42 {
      %c0_19 = arith.constant 0 : index
      %c0_20 = arith.constant 0 : index
      %43 = vector.load %arg8[%c0_19, %c0_20] : memref<2x128xf32, #tpu.memory_space<vmem>>, vector<2x128xf32>
      %cst_21 = arith.constant 3.906250e-03 : f32
      %44 = vector.broadcast %cst_21 : f32 to vector<2x128xf32>
      %45 = arith.mulf %43, %44 : vector<2x128xf32>
      %c0_22 = arith.constant 0 : index
      %c0_23 = arith.constant 0 : index
      %46 = vector.load %arg5[%c0_22, %c0_23] : memref<128x4xf32, #tpu.memory_space<vmem>>, vector<128x4xf32>
      %cst_24 = arith.constant dense<0.000000e+00> : vector<2x4xf32>
      %47 = tpu.matmul %45, %46, %cst_24 {dimension_numbers = #tpu.dot_dimension_numbers<[1], [0], [0], [1], [0, 0, 1, 1], [], []>} : vector<2x128xf32>, vector<128x4xf32>, vector<2x4xf32> -> vector<2x4xf32>
      %c0_25 = arith.constant 0 : index
      %c0_26 = arith.constant 0 : index
      %48 = vector.load %arg6[%c0_25, %c0_26] : memref<1x4xf32, #tpu.memory_space<vmem>>, vector<1x4xf32>
      %49 = vector.broadcast %48 : vector<1x4xf32> to vector<2x4xf32>
      %50 = arith.addf %47, %49 : vector<2x4xf32>
      %c0_27 = arith.constant 0 : index
      %c0_28 = arith.constant 0 : index
      %c0_29 = arith.constant 0 : index
      %51 = vector.load %arg7[%c0_27, %c0_28, %c0_29] : memref<1x2x4xf32, #tpu.memory_space<vmem>>, vector<1x2x4xf32>
      %52 = vector.shape_cast %51 : vector<1x2x4xf32> to vector<2x4xf32>
      %53 = vector.shape_cast %50 : vector<2x4xf32> to vector<1x2x4xf32>
      tpu.vector_store %arg7[%c0_27, %c0_28, %c0_29], %53 {strides = array<i32>} : memref<1x2x4xf32, #tpu.memory_space<vmem>>, vector<1x2x4xf32>,
    } else {
    }
    return
  }
  func.func @transform_0(%arg0: i32, %arg1: i32) -> (i32, i32, i32, i32) {
    %c0_i32 = arith.constant 0 : i32
    %c0_i32_0 = arith.constant 0 : i32
    %c0_i32_1 = arith.constant 0 : i32
    return %arg1, %arg0, %c0_i32, %c0_i32_0 : i32, i32, i32, i32
  }
  func.func @transform_1(%arg0: i32, %arg1: i32) -> (i32, i32) {
    %c0_i32 = arith.constant 0 : i32
    %c0_i32_0 = arith.constant 0 : i32
    %c0_i32_1 = arith.constant 0 : i32
    return %c0_i32, %c0_i32_0 : i32, i32
  }
  func.func @transform_2(%arg0: i32, %arg1: i32) -> (i32, i32) {
    %c0_i32 = arith.constant 0 : i32
    %c0_i32_0 = arith.constant 0 : i32
    %c0_i32_1 = arith.constant 0 : i32
    return %c0_i32, %c0_i32_0 : i32, i32
  }
  func.func @transform_3(%arg0: i32, %arg1: i32) -> (i32, i32) {
    %c0_i32 = arith.constant 0 : i32
    %c0_i32_0 = arith.constant 0 : i32
    %c0_i32_1 = arith.constant 0 : i32
    return %c0_i32, %c0_i32_0 : i32, i32
  }
  func.func @transform_4(%arg0: i32, %arg1: i32) -> (i32, i32) {
    %c0_i32 = arith.constant 0 : i32
    %c0_i32_0 = arith.constant 0 : i32
    %c0_i32_1 = arith.constant 0 : i32
    return %c0_i32, %c0_i32_0 : i32, i32
  }
  func.func @transform_5(%arg0: i32, %arg1: i32) -> (i32, i32, i32) {
    %c0_i32 = arith.constant 0 : i32
    %c0_i32_0 = arith.constant 0 : i32
    %c0_i32_1 = arith.constant 0 : i32
    return %arg0, %c0_i32, %c0_i32_0 : i32, i32, i32
  }
}

</mosaic_0001>

<bundles_post_ra>
// kernel: fused_backbone_forward.1
= control target key start
LH: loop header
LB: loop body
LE: loop exit
PB: predicated region body
PF: predicated region fallthrough
CT: control target
= control target key end

     0   :  { %10 = vsyncpa [#allocation4], 0  ;;  %s2118_s0 = inlined_call_operand.vmem [shape: bf16[2,4,160,12], index: 0, kind: input, shape index: {}]   ;;  %s2119_s1 = inlined_call_operand.vmem [shape: bf16[36,128], index: 1, kind: input, shape index: {}]   ;;  %s2120_s2 = inlined_call_operand.vmem [shape: f32[1,128], index: 2, kind: input, shape index: {}]   ;;  %s2121_s3 = inlined_call_operand.vmem [shape: f32[128,4], index: 3, kind: input, shape index: {}]   ;;  %s2122_s4 = inlined_call_operand.vmem [shape: f32[1,4], index: 4, kind: input, shape index: {}]   ;;  %s2123_s5 = inlined_call_operand.hbm [shape: f32[2,2,4], index: 5, kind: output, shape index: {}]  }
   0x1   :  { %12 = vsyncpa [#allocation4 + $0x1], 0  ;;  %s1574_s18 = smov 0   ;;  %s1576_s19 = smov 0  }
   0x2   :  { %s1578_s20 = smov 0   ;;  %s1580_s21 = smov 0  }
   0x3   :  { %s1582_s22 = smov 0   ;;  %s1584_s23 = smov 0  }
   0x4   :  { %s1586_s24 = smov 0   ;;  %s1588_s25 = smov 0  }
   0x5 LB: > { %s1039_s26 = sadd.s32 4294967295, %s1539_s25   ;;  %s1040_s27 = sadd.s32 4294967294, %s1539_s25   ;;  %s1539_s25 = sphi %s1588_s25, %s18_s25   ;;  %s1535_s24 = sphi %s1586_s24, %s2138_s24   ;;  %s1531_s23 = sphi %s1584_s23, %s2137_s23   ;;  %s1527_s22 = sphi %s1582_s22, %s2136_s22   ;;  %s1523_s21 = sphi %s1580_s21, %s2135_s21   ;;  %s1519_s20 = sphi %s1578_s20, %s2134_s20   ;;  %s1515_s19 = sphi %s1576_s19, %s2133_s19   ;;  %s1511_s18 = sphi %s1574_s18, %s2132_s18  }
   0x6   : > { %s27_s28 = sadd.s32 1, %s1531_s23  ;;  %s30_s29 = sadd.s32 1, %s1535_s24 }
   0x7   : > { %p28_p0 = scmp.ge.s32.totalorder %s27_s28, 2  ;;  %p159_p1 = scmp.ne.s32.totalorder %s1519_s20, %s1515_s19 }
   0x8   : > { %p160_p2 = scmp.eq.s32.totalorder %s1039_s26, 3  ;;  %p165_p4 = scmp.ne.s32.totalorder %s1515_s19, %s1511_s18 }
   0x9   : > { %s2140_s28 = smov (%p28_p0, %s27_s28), 0  ;;  %s2142_s29 = smov (!%p28_p0, %s30_s29), %s1535_s24 }
   0xa   : > { %p1621_p3 = por %p160_p2, %p159_p1  ;;  %p32_p5 = scmp.ge.s32.totalorder %s2142_s29, 2 }
   0xb   : > { %p166_p6 = scmp.eq.s32.totalorder %s1040_s27, 3  ;;  %p1043_p7 = scmp.ge.s32.totalorder %s1539_s25, 1 }
   0xc   : > { %p210_p8 = scmp.lt.s32.totalorder %s1539_s25, 5  ;;  %s2144_s29 = smov (%p32_p5, %s2142_s29), 0 }
   0xd   : > { %p1631_p9 = por %p166_p6, %p165_p4  ;;  %s146_s7 = ssub.s32 %s1535_s24, %s2144_s29 }
   0xe   : > { %p211_p10 = pnand %p1043_p7, %p210_p8  ;;  %s149_s8 = sadd.s32 1, %s1519_s20 }
   0xf   : > { %p147_p11 = scmp.eq.s32.totalorder %s146_s7, 0  ;;  %s240_s10 = sand.u32 (!%p211_p10), 1, %s1515_s19  }
  0x10   : > { %214 = sbr.rel (%p211_p10) target bundleno = 576 (0x240), region = 40  ;;  %s1642_s11 = sshll.u32 (!%p211_p10), %s1527_s22, 1 }
  0x11   : > { %s1639_s9 = scalar_select %p147_p11, %s1519_s20, %s149_s8  }
  0x12   : > { %s1646_s12 = sshll.u32 (!%p211_p10), %s240_s10, 1  ;;  %p244_p12 = scmp.lt.s32.totalorder (!%p211_p10), %s1523_s21, 1 }
  0x13   : > { %p246_p13 = scmp.lt.s32.totalorder (!%p211_p10), %s1642_s11, 3  ;;  %s242_s22 = scalar_lea.vmem (!%p211_p10), [#allocation3], %s1646_s12 }
  0x14   : > { %p1047_p0 = scmp.ne.s32.totalorder (!%p211_p10), %s1523_s21, 0 }
  0x15   : > { %s245_s13 = scalar_select %p244_p12, %s1523_s21, 1 }
  0x16   : > { %s247_s14 = scalar_select %p246_p13, %s1642_s11, 3 }
  0x17   : > { %s1208_s15 = smul.u32 80, %s245_s13 }
  0x18   : > { %s1207_s16 = smul.u32 20, %s247_s14 }
  0x19   : > { %258 = sbr.rel (%p1047_p0) target bundleno = 32 (0x20), region = 44 }
  0x1a   : > { %s250_s17 = sadd.s32 %s1208_s15, %s1207_s16 }
  0x1b   : > { %s1046_s26 = sshll.u32 %s250_s17, 2 }
  0x1c   : > { %s1655_s8 = scalar_lea.vmem %s2118_s0, %s1046_s26 }
  0x1e   : > { %v1541_v0 = vmov 0.0  }
  0x1f   : > { %259 = vst [vmem:[#allocation2] sm:$0x3] %v1541_v0 }
  0x20 PF: > { %v1660_v1 = vld [vmem:[%s1655_s8 + $0x58] sm:$0xff]   ;;  %v1663_v2 = vld [vmem:[%s1655_s8 + $0x8] sm:$0xff]   ;;  %v1670_v7 = vld [vmem:[%s1655_s8 + $0x60] sm:$0xff]   ;;  %s1542_s13 = smov 12   ;;  %s1543_s14 = smov 24   ;;  %vm724_vm0 = vcmask 1041408  }
  0x21   : > { %v1145_v3 = vunpack.c.l.bf16 %v1660_v1  ;;  %v1146_v4 = vunpack.c.h.bf16 %v1660_v1  ;;  %v1105_v5 = vunpack.c.l.bf16 %v1663_v2  ;;  %v1106_v6 = vunpack.c.h.bf16 %v1663_v2  ;;  %v1673_v8 = vld [vmem:[%s1655_s8 + $0x10] sm:$0xff]   ;;  %v1690_v15 = vld [vmem:[%s1655_s8 + $0x78] sm:$0xff]   ;;  %v1704_v20 = vld [vmem:[%s1655_s8 + $0x68] sm:$0xff]   ;;  %p1092_p1 = scmp.ne.s32.totalorder %s1523_s21, 1 }
  0x22   : > { %v1149_v11 = vunpack.c.l.bf16 %v1670_v7  ;;  %v1150_v12 = vunpack.c.h.bf16 %v1670_v7  ;;  %v1109_v13 = vunpack.c.l.bf16 %v1673_v8  ;;  %v1110_v14 = vunpack.c.h.bf16 %v1673_v8  ;;  %v1707_v21 = vld [vmem:[%s1655_s8 + $0x80] sm:$0xff]   ;;  %v1729_v29 = vld [vmem:[%s1655_s8 + $0x28] sm:$0xff]   ;;  %v1732_v30 = vld [vmem:[%s1655_s8 + $0x18] sm:$0xff]  }
  0x23   : > { %v1283_v9 = vpack.i.bf16 %v1146_v4, %v1145_v3  ;;  %v1293_v10 = vpack.i.bf16 %v1106_v6, %v1105_v5  ;;  %v1161_v17 = vunpack.c.l.bf16 %v1690_v15  ;;  %v1162_v18 = vunpack.c.h.bf16 %v1690_v15  ;;  %v1741_v35 = vld [vmem:[%s1655_s8 + $0x30] sm:$0xff]   ;;  %v1767_v44 = vld [vmem:[%s1655_s8 + $0x88] sm:$0xff]   ;;  %v1783_v49 = vld [vmem:[%s1655_s8 + $0x20] sm:$0xff]  }
  0x24   : > { %v1303_v16 = vpack.i.bf16 %v1150_v12, %v1149_v11  ;;  %v1298_v19 = vpack.i.bf16 %v1110_v14, %v1109_v13  ;;  %v1153_v23 = vunpack.c.l.bf16 %v1704_v20  ;;  %v1154_v24 = vunpack.c.h.bf16 %v1704_v20  ;;  %v1761_v41 = vld [vmem:[%s1655_s8 + $0x70] sm:$0xff]   ;;  %v1786_v50 = vld [vmem:[%s1655_s8 + $0x38] sm:$0xff]   ;;  %v1186_v61 = vld [vmem:[%s1655_s8 + $0x40] sm:$0xff]  }
  0x25   : > { %1284 = vrot.lane.b32.xlu0 %v1283_v9, %s1542_s13  ;;  %1294 = vrot.lane.b32.xlu1 %v1293_v10, %s1542_s13  ;;  %v1308_v22 = vpack.i.bf16 %v1162_v18, %v1161_v17  ;;  %v1165_v25 = vunpack.c.l.bf16 %v1707_v21  ;;  %v1166_v26 = vunpack.c.h.bf16 %v1707_v21  ;;  %v1121_v31 = vunpack.c.l.bf16 %v1729_v29  ;;  %v1196_v57 = vld [vmem:[%s1655_s8 + $0x90] sm:$0xff]   ;;  %v1197_v0 = vld [vmem:[%s1655_s8 + $0x98] sm:$0xff]  }
  0x26   : > { %1304 = vrot.lane.b32.xlu2 %v1303_v16, %s1542_s13  ;;  %v1313_v27 = vpack.i.bf16 %v1154_v24, %v1153_v23  ;;  %v1122_v32 = vunpack.c.h.bf16 %v1729_v29  ;;  %v1113_v33 = vunpack.c.l.bf16 %v1732_v30  ;;  %v1114_v34 = vunpack.c.h.bf16 %v1732_v30 }
  0x27   : > { %v1318_v28 = vpack.i.bf16 %v1166_v26, %v1165_v25  ;;  %v1125_v36 = vunpack.c.l.bf16 %v1741_v35  ;;  %v1126_v37 = vunpack.c.h.bf16 %v1741_v35  ;;  %v1157_v42 = vunpack.c.l.bf16 %v1761_v41 }
  0x28   : > { %v1328_v38 = vpack.i.bf16 %v1122_v32, %v1121_v31  ;;  %v1333_v39 = vpack.i.bf16 %v1114_v34, %v1113_v33  ;;  %v1158_v43 = vunpack.c.h.bf16 %v1761_v41  ;;  %v2126_v46 = vunpack.c.l.bf16 %v1767_v44 }
  0x29   : > { %v1338_v40 = vpack.i.bf16 %v1126_v37, %v1125_v36  ;;  %v1170_v47 = vunpack.c.h.bf16 %v1767_v44  ;;  %v1117_v51 = vunpack.c.l.bf16 %v1783_v49  ;;  %v1118_v52 = vunpack.c.h.bf16 %v1783_v49 }
  0x2a   : > { %v1353_v45 = vpack.i.bf16 %v1158_v43, %v1157_v42  ;;  %v2124_v53 = vunpack.c.l.bf16 %v1786_v50  ;;  %v2125_v54 = vunpack.c.h.bf16 %v1786_v50  ;;  %v1173_v58 = vunpack.c.l.bf16 %v1196_v57 }
  0x2b   : > { %v1358_v48 = vpack.i.bf16 %v1170_v47, %v2126_v46  ;;  %v1373_v55 = vpack.i.bf16 %v1118_v52, %v1117_v51  ;;  %v1174_v59 = vunpack.c.h.bf16 %v1196_v57  ;;  %v1133_v62 = vunpack.c.l.bf16 %v1186_v61 }
  0x2c   : > { %v1378_v56 = vpack.i.bf16 %v2125_v54, %v2124_v53  ;;  %v1134_v63 = vunpack.c.h.bf16 %v1186_v61  ;;  %v1177_v9 = vunpack.c.l.bf16 %v1197_v0  ;;  %v1178_v10 = vunpack.c.h.bf16 %v1197_v0 }
  0x2d   : > { %1289 = vrot.lane.b32.xlu0 %v1303_v16, %s1543_s14  ;;  %1299 = vrot.lane.b32.xlu1 %v1298_v19, %s1543_s14  ;;  %v1398_v60 = vpack.i.bf16 %v1174_v59, %v1173_v58  ;;  %vm414_vm1 = vcmask 97280   ;;  %vm431_vm2 = vcmask 195584   ;;  %vm675_vm3 = vcmask 293888  }
  0x2e   : > { %1309 = vrot.lane.b32.xlu2 %v1308_v22, %s1542_s13  ;;  %v1418_v16 = vpack.i.bf16 %v1134_v63, %v1133_v62  ;;  %v1100_v62 = vld [vmem:[%s1655_s8] sm:$0xff]   ;;  %v1188_v63 = vld [vmem:[%s1655_s8 + $0x50] sm:$0xff]   ;;  %vm892_vm4 = vcmask 1040384  }
  0x35   : > { %1314 = vrot.lane.b32.xlu0 %v1313_v27, %s1543_s14  ;;  %1319 = vrot.lane.b32.xlu1 %v1318_v28, %s1543_s14 }
  0x36   : > { %1324 = vrot.lane.b32.xlu2 %v1298_v19, %s1542_s13  ;;  %v1187_v19 = vld [vmem:[%s1655_s8 + $0x48] sm:$0xff]  }
  0x3d   : > { %1329 = vrot.lane.b32.xlu0 %v1328_v38, %s1542_s13  ;;  %1334 = vrot.lane.b32.xlu1 %v1333_v39, %s1543_s14 }
  0x3e   : > { %1339 = vrot.lane.b32.xlu2 %v1338_v40, %s1543_s14 }
  0x45   : > { %1344 = vrot.lane.b32.xlu0 %v1313_v27, %s1542_s13  ;;  %1349 = vrot.lane.b32.xlu1 %v1318_v28, %s1542_s13  ;;  %v1428_v27 = vpack.i.bf16 %v1178_v10, %v1177_v9  ;;  %v1138_v28 = vunpack.c.h.bf16 %v1187_v19  ;;  %v1101_v10 = vunpack.c.l.bf16 %v1100_v62 }
  0x46   : > { %1354 = vrot.lane.b32.xlu2 %v1353_v45, %s1543_s14 }
  0x4d   : > { %1359 = vrot.lane.b32.xlu0 %v1358_v48, %s1543_s14  ;;  %1364 = vrot.lane.b32.xlu1 %v1333_v39, %s1542_s13 }
  0x4e   : > { %1369 = vrot.lane.b32.xlu2 %v1338_v40, %s1542_s13  ;;  %v655_v40 = vld [vmem:[%s2119_s1 + $0x10] sm:$0x3] }
  0x55   : > { %1374 = vrot.lane.b32.xlu0 %v1373_v55, %s1543_s14  ;;  %1379 = vrot.lane.b32.xlu1 %v1378_v56, %s1543_s14 }
  0x56   : > { %1384 = vrot.lane.b32.xlu2 %v1353_v45, %s1542_s13 }
  0x5d   : > { %1389 = vrot.lane.b32.xlu0 %v1358_v48, %s1542_s13  ;;  %1394 = vrot.lane.b32.xlu1 %v1308_v22, %s1543_s14  ;;  %v1137_v22 = vunpack.c.l.bf16 %v1187_v19  ;;  %v1141_v19 = vunpack.c.l.bf16 %v1188_v63 }
  0x5e   : > { %1399 = vrot.lane.b32.xlu2 %v1398_v60, %s1543_s14 }
  0x5f   : > { %v1438_v39 = vpack.i.bf16 %v1138_v28, %v1137_v22 }
  0x65   : > { %1404 = vrot.lane.b32.xlu0 %v1373_v55, %s1542_s13  ;;  %1409 = vrot.lane.b32.xlu1 %v1378_v56, %s1542_s13  ;;  %v1098_v55 = vld [vmem:[%s2119_s1 + $0x8] sm:$0xff]  ;;  %v1097_v56 = vld [vmem:[%s2119_s1] sm:$0xff] }
  0x66   : > { %1414 = vrot.lane.b32.xlu2 %v1328_v38, %s1543_s14  ;;  %v669_v38 = vunpack.c.l.b16 %v655_v40 }
  0x68   : > { %v672_v45 = vpack.c.b16 %v669_v38, %v669_v38 }
  0x6a   : > { %v726_v48 = vsel %vm724_vm0, %v672_v45, 0 }
  0x6b   : > { %733 = vmatpush.bf16.msra.mxu0 %v726_v48  ;;  %1199 = vmatpush.bf16.msra.mxu2 %v726_v48 }
  0x6c   : > { %1200 = vmatpush.bf16.msra.mxu3 %v726_v48  ;;  %1198 = vmatpush.bf16.msra.mxu1 %v726_v48 }
  0x6d   : > { %1419 = vrot.lane.b32.xlu0 %v1418_v16, %s1543_s14  ;;  %1424 = vrot.lane.b32.xlu1 %v1398_v60, %s1542_s13 }
  0x6e   : > { %1429 = vrot.lane.b32.xlu2 %v1428_v27, %s1543_s14  ;;  %v1142_v27 = vunpack.c.h.bf16 %v1188_v63 }
  0x6f   : > { %734 = vmatpush.bf16.msra.mxu0 %v1098_v55  ;;  %1202 = vmatpush.bf16.msra.mxu2 %v1098_v55 }
  0x70   : > { %1203 = vmatpush.bf16.msra.mxu3 %v1098_v55  ;;  %1201 = vmatpush.bf16.msra.mxu1 %v1098_v55 }
  0x73   : > { %735 = vmatpush.bf16.msra.mxu0 %v1097_v56  ;;  %1205 = vmatpush.bf16.msra.mxu2 %v1097_v56 }
  0x74   : > { %1206 = vmatpush.bf16.msra.mxu3 %v1097_v56  ;;  %1204 = vmatpush.bf16.msra.mxu1 %v1097_v56 }
  0x75   : > { %1434 = vrot.lane.b32.xlu0 %v1418_v16, %s1542_s13  ;;  %1439 = vrot.lane.b32.xlu1 %v1438_v39, %s1543_s14  ;;  %v1102_v16 = vunpack.c.h.bf16 %v1100_v62 }
  0x80   : > { %v1830_v57 = vpop.permute.xlu2 %1304 }
  0x88   : > { %v1310_v58 = vpop.permute.xlu2 %1309 }
  0x90   : > { %v1325_v59 = vpop.permute.xlu2 %1324 }
  0x97   : > { %v1285_v60 = vpop.permute.xlu0 %1284  ;;  %v1295_v61 = vpop.permute.xlu1 %1294 }
  0x98   : > { %v1297_v0 = vunpack.i.h.bf16 %v1295_v61  ;;  %v1296_v9 = vunpack.i.l.bf16 %v1295_v61  ;;  %v1287_v22 = vunpack.i.h.bf16 %v1285_v60  ;;  %v1286_v28 = vunpack.i.l.bf16 %v1285_v60  ;;  %v1340_v54 = vpop.permute.xlu2 %1339 }
  0x9a   : > { %v415_v39 = vsel %vm414_vm1, %v1101_v10, %v1296_v9  ;;  %v416_v40 = vsel %vm414_vm1, %v1102_v16, %v1297_v0  ;;  %v604_v61 = vsel %vm414_vm1, %v1142_v27, %v1287_v22  ;;  %v603_v62 = vsel %vm414_vm1, %v1141_v19, %v1286_v28 }
  0x9b   : > { %v1312_v10 = vunpack.i.h.bf16 %v1310_v58  ;;  %v1311_v16 = vunpack.i.l.bf16 %v1310_v58  ;;  %v1307_v58 = vunpack.i.h.bf16 %v1830_v57 }
  0x9d   : > { %v612_v19 = vsel %vm414_vm1, %v1158_v43, %v1312_v10 }
  0x9f   : > { %v1290_v38 = vpop.permute.xlu0 %1289  ;;  %v1300_v45 = vpop.permute.xlu1 %1299 }
  0xa0   : > { %v1292_v48 = vunpack.i.h.bf16 %v1290_v38  ;;  %v1291_v55 = vunpack.i.l.bf16 %v1290_v38  ;;  %v1302_v56 = vunpack.i.h.bf16 %v1300_v45  ;;  %v1301_v53 = vunpack.i.l.bf16 %v1300_v45 }
  0xa1   : > { %v1327_v45 = vunpack.i.h.bf16 %v1325_v59 }
  0xa2   : > { %v432_v60 = vsel %vm431_vm2, %v415_v39, %v1301_v53  ;;  %v433_v63 = vsel %vm431_vm2, %v416_v40, %v1302_v56  ;;  %v619_v9 = vsel %vm431_vm2, %v603_v62, %v1291_v55  ;;  %v620_v0 = vsel %vm431_vm2, %v604_v61, %v1292_v48  ;;  %v1355_v56 = vpop.permute.xlu2 %1354 }
  0xa3   : > { %v635_v46 = vpack.c.bf16 %v433_v63, %v432_v60  ;;  %v643_v38 = vpack.c.bf16 %v620_v0, %v619_v9  ;;  %v611_v53 = vsel %vm414_vm1, %v1157_v42, %v1311_v16  ;;  %v1306_v40 = vunpack.i.l.bf16 %v1830_v57 }
  0xa4   : > { %v606_v42 = vsel %vm414_vm1, %v1146_v4, %v1307_v58  ;;  %v418_v62 = vsel %vm414_vm1, %v1106_v6, %v1327_v45  ;;  %v1342_v9 = vunpack.i.h.bf16 %v1340_v54  ;;  %v1341_v0 = vunpack.i.l.bf16 %v1340_v54 }
  0xa5   : > { %1076 = vmatmul.msk.bf16.vlgmr.msra.gmra.mxu0 %vm675_vm3, %v635_v46  ;;  %1084 = vmatmul.msk.bf16.vlgmr.msra.gmra.mxu2 %vm675_vm3, %v643_v38  ;;  %v1326_v46 = vunpack.i.l.bf16 %v1325_v59  ;;  %v605_v57 = vsel %vm414_vm1, %v1145_v3, %v1306_v40 }
  0xa7   : > { %v1315_v27 = vpop.permute.xlu0 %1314  ;;  %v1320_v22 = vpop.permute.xlu1 %1319  ;;  %v417_v59 = vsel %vm414_vm1, %v1105_v5, %v1326_v46  ;;  %v1357_v46 = vunpack.i.h.bf16 %v1355_v56 }
  0xa8   : > { %v1322_v28 = vunpack.i.h.bf16 %v1320_v22  ;;  %v1321_v39 = vunpack.i.l.bf16 %v1320_v22  ;;  %v1317_v43 = vunpack.i.h.bf16 %v1315_v27  ;;  %v1316_v61 = vunpack.i.l.bf16 %v1315_v27 }
  0xaa   : > { %v627_v48 = vsel %vm431_vm2, %v611_v53, %v1321_v39  ;;  %v628_v55 = vsel %vm431_vm2, %v612_v19, %v1322_v28  ;;  %v621_v10 = vsel %vm431_vm2, %v605_v57, %v1316_v61  ;;  %v622_v4 = vsel %vm431_vm2, %v606_v42, %v1317_v43  ;;  %v1370_v39 = vpop.permute.xlu2 %1369 }
  0xab   : > { %v647_v41 = vpack.c.bf16 %v628_v55, %v627_v48  ;;  %v644_v53 = vpack.c.bf16 %v622_v4, %v621_v10  ;;  %v1356_v48 = vunpack.i.l.bf16 %v1355_v56  ;;  %v1372_v7 = vunpack.i.h.bf16 %v1370_v39 }
  0xad   : > { %1088 = vmatmul.msk.bf16.vlgmr.msra.gmra.mxu3 %vm675_vm3, %v647_v41 }
  0xaf   : > { %v1330_v60 = vpop.permute.xlu0 %1329  ;;  %v1335_v63 = vpop.permute.xlu1 %1334 }
  0xb0   : > { %v1332_v16 = vunpack.i.h.bf16 %v1330_v60  ;;  %v1331_v1 = vunpack.i.l.bf16 %v1330_v60  ;;  %v1337_v38 = vunpack.i.h.bf16 %v1335_v63  ;;  %v1336_v3 = vunpack.i.l.bf16 %v1335_v63 }
  0xb1   : > { %v1371_v63 = vunpack.i.l.bf16 %v1370_v39 }
  0xb2   : > { %v423_v5 = vsel %vm414_vm1, %v1117_v51, %v1331_v1  ;;  %v424_v2 = vsel %vm414_vm1, %v1118_v52, %v1332_v16  ;;  %v434_v6 = vsel %vm431_vm2, %v417_v59, %v1336_v3  ;;  %v435_v54 = vsel %vm431_vm2, %v418_v62, %v1337_v38  ;;  %v1385_v61 = vpop.permute.xlu2 %1384 }
  0xb3   : > { %v636_v19 = vpack.c.bf16 %v435_v54, %v434_v6  ;;  %v440_v27 = vsel %vm431_vm2, %v423_v5, %v1341_v0  ;;  %v441_v22 = vsel %vm431_vm2, %v424_v2, %v1342_v9  ;;  %v426_v16 = vsel %vm414_vm1, %v1122_v32, %v1372_v7 }
  0xb4   : > { %v639_v28 = vpack.c.bf16 %v441_v22, %v440_v27  ;;  %v425_v1 = vsel %vm414_vm1, %v1121_v31, %v1371_v63  ;;  %v1387_v32 = vunpack.i.h.bf16 %v1385_v61  ;;  %v1386_v27 = vunpack.i.l.bf16 %v1385_v61 }
  0xb5   : > { %1077 = vmatmul.msk.bf16.gmra.mxu0 %vm675_vm3, %v636_v19  ;;  %1085 = vmatmul.msk.bf16.gmra.mxu2 %vm675_vm3, %v644_v53 }
  0xb6   : > { %1080 = vmatmul.msk.bf16.vlgmr.msra.gmra.mxu1 %vm675_vm3, %v639_v28  ;;  %v610_v31 = vsel %vm414_vm1, %v1154_v24, %v1387_v32  ;;  %v609_v28 = vsel %vm414_vm1, %v1153_v23, %v1386_v27  ;;  %v2131_v27 = vunpack.c.l.bf16 %v1786_v50 }
  0xb7   : > { %v1345_v49 = vpop.permute.xlu0 %1344  ;;  %v1350_v51 = vpop.permute.xlu1 %1349 }
  0xb8   : > { %v1347_v52 = vunpack.i.h.bf16 %v1345_v49  ;;  %v1346_v58 = vunpack.i.l.bf16 %v1345_v49  ;;  %v1352_v40 = vunpack.i.h.bf16 %v1350_v51  ;;  %v1351_v45 = vunpack.i.l.bf16 %v1350_v51 }
  0xba   : > { %v608_v55 = vsel %vm414_vm1, %v1150_v12, %v1347_v52  ;;  %v607_v43 = vsel %vm414_vm1, %v1149_v11, %v1346_v58  ;;  %v614_v41 = vsel %vm414_vm1, %v1162_v18, %v1352_v40  ;;  %v613_v42 = vsel %vm414_vm1, %v1161_v17, %v1351_v45  ;;  %v1400_v19 = vpop.permute.xlu2 %1399 }
  0xbb   : > { %v623_v60 = vsel %vm431_vm2, %v607_v43, %v1356_v48  ;;  %v624_v12 = vsel %vm431_vm2, %v608_v55, %v1357_v46  ;;  %v1402_v51 = vunpack.i.h.bf16 %v1400_v19  ;;  %v1401_v52 = vunpack.i.l.bf16 %v1400_v19 }
  0xbc   : > { %v645_v10 = vpack.c.bf16 %v624_v12, %v623_v60 }
  0xbf   : > { %v1360_v57 = vpop.permute.xlu0 %1359  ;;  %v1365_v59 = vpop.permute.xlu1 %1364 }
  0xc0   : > { %v1362_v56 = vunpack.i.h.bf16 %v1360_v57  ;;  %v1361_v62 = vunpack.i.l.bf16 %v1360_v57  ;;  %v1367_v0 = vunpack.i.h.bf16 %v1365_v59  ;;  %v1366_v18 = vunpack.i.l.bf16 %v1365_v59 }
  0xc2   : > { %v629_v11 = vsel %vm431_vm2, %v613_v42, %v1361_v62  ;;  %v630_v9 = vsel %vm431_vm2, %v614_v41, %v1362_v56  ;;  %v420_v17 = vsel %vm414_vm1, %v1110_v14, %v1367_v0  ;;  %v419_v4 = vsel %vm414_vm1, %v1109_v13, %v1366_v18  ;;  %v1415_v55 = vpop.permute.xlu2 %1414 }
  0xc3   : > { %v648_v15 = vpack.c.bf16 %v630_v9, %v629_v11  ;;  %v1417_v21 = vunpack.i.h.bf16 %v1415_v55  ;;  %v1416_v59 = vunpack.i.l.bf16 %v1415_v55 }
  0xc5   : > { %1086 = vmatmul.msk.bf16.gmra.mxu2 %vm675_vm3, %v645_v10  ;;  %1089 = vmatmul.msk.bf16.gmra.mxu3 %vm675_vm3, %v648_v15 }
  0xc7   : > { %v1375_v38 = vpop.permute.xlu0 %1374  ;;  %v1380_v3 = vpop.permute.xlu1 %1379 }
  0xc8   : > { %v1377_v5 = vunpack.i.h.bf16 %v1375_v38  ;;  %v1376_v2 = vunpack.i.l.bf16 %v1375_v38  ;;  %v1382_v6 = vunpack.i.h.bf16 %v1380_v3  ;;  %v1381_v54 = vunpack.i.l.bf16 %v1380_v3 }
  0xc9   : > { %v2129_v3 = vunpack.c.l.bf16 %v1767_v44 }
  0xca   : > { %v436_v14 = vsel %vm431_vm2, %v419_v4, %v1376_v2  ;;  %v437_v8 = vsel %vm431_vm2, %v420_v17, %v1377_v5  ;;  %v442_v13 = vsel %vm431_vm2, %v425_v1, %v1381_v54  ;;  %v443_v53 = vsel %vm431_vm2, %v426_v16, %v1382_v6  ;;  %v1430_v0 = vpop.permute.xlu2 %1429 }
  0xcb   : > { %v637_v29 = vpack.c.bf16 %v437_v8, %v436_v14  ;;  %v640_v22 = vpack.c.bf16 %v443_v53, %v442_v13  ;;  %v1432_v10 = vunpack.i.h.bf16 %v1430_v0  ;;  %v1431_v15 = vunpack.i.l.bf16 %v1430_v0 }
  0xcc   : > { %v2130_v53 = vunpack.c.h.bf16 %v1786_v50 }
  0xcd   : > { %1078 = vmatmul.msk.bf16.gmra.mxu0 %vm675_vm3, %v637_v29  ;;  %1081 = vmatmul.msk.bf16.gmra.mxu1 %vm675_vm3, %v640_v22 }
  0xcf   : > { %v1390_v39 = vpop.permute.xlu0 %1389  ;;  %v1395_v49 = vpop.permute.xlu1 %1394 }
  0xd0   : > { %v1392_v58 = vunpack.i.h.bf16 %v1390_v39  ;;  %v1391_v40 = vunpack.i.l.bf16 %v1390_v39  ;;  %v1397_v45 = vunpack.i.h.bf16 %v1395_v49  ;;  %v1396_v46 = vunpack.i.l.bf16 %v1395_v49 }
  0xd2   : > { %v616_v48 = vsel %vm414_vm1, %v1166_v26, %v1392_v58  ;;  %v615_v24 = vsel %vm414_vm1, %v1165_v25, %v1391_v40  ;;  %v625_v20 = vsel %vm431_vm2, %v609_v28, %v1396_v46  ;;  %v626_v23 = vsel %vm431_vm2, %v610_v31, %v1397_v45 }
  0xd3   : > { %v646_v43 = vpack.c.bf16 %v626_v23, %v625_v20  ;;  %v631_v61 = vsel %vm431_vm2, %v615_v24, %v1401_v52  ;;  %v632_v41 = vsel %vm431_vm2, %v616_v48, %v1402_v51 }
  0xd4   : > { %v649_v42 = vpack.c.bf16 %v632_v41, %v631_v61  ;;  %v1979_v61 = vld [vmem:[%s2120_s2] ss:$0 sm:$0xff] }
  0xd5   : > { %1087 = vmatmul.msk.bf16.gmra.mxu2 %vm675_vm3, %v646_v43 }
  0xd6   : > { %1090 = vmatmul.msk.bf16.gmra.mxu3 %vm675_vm3, %v649_v42 }
  0xd7   : > { %v1405_v26 = vpop.permute.xlu0 %1404  ;;  %v1410_v57 = vpop.permute.xlu1 %1409 }
  0xd8   : > { %v1407_v25 = vunpack.i.h.bf16 %v1405_v26  ;;  %v1406_v56 = vunpack.i.l.bf16 %v1405_v26  ;;  %v1412_v12 = vunpack.i.h.bf16 %v1410_v57  ;;  %v1411_v7 = vunpack.i.l.bf16 %v1410_v57 }
  0xda   : > { %v421_v62 = vsel %vm414_vm1, %v1113_v33, %v1406_v56  ;;  %v422_v60 = vsel %vm414_vm1, %v1114_v34, %v1407_v25  ;;  %v428_v18 = vsel %vm414_vm1, %v1126_v37, %v1412_v12  ;;  %v427_v30 = vsel %vm414_vm1, %v1125_v36, %v1411_v7 }
  0xdb   : > { %v438_v63 = vsel %vm431_vm2, %v421_v62, %v1416_v59  ;;  %v439_v11 = vsel %vm431_vm2, %v422_v60, %v1417_v21 }
  0xdc   : > { %v638_v9 = vpack.c.bf16 %v439_v11, %v438_v63 }
  0xde   : > { %1079 = vmatmul.msk.bf16.gmra.mxu0 %vm675_vm3, %v638_v9 }
  0xdf   : > { %v1420_v33 = vpop.permute.xlu0 %1419  ;;  %v1425_v34 = vpop.permute.xlu1 %1424 }
  0xe0   : > { %v1422_v17 = vunpack.i.h.bf16 %v1420_v33  ;;  %v1421_v4 = vunpack.i.l.bf16 %v1420_v33  ;;  %v1427_v16 = vunpack.i.h.bf16 %v1425_v34  ;;  %v1426_v1 = vunpack.i.l.bf16 %v1425_v34 }
  0xe2   : > { %v618_v38 = vsel %vm414_vm1, %v1170_v47, %v1427_v16  ;;  %v617_v37 = vsel %vm414_vm1, %v2129_v3, %v1426_v1  ;;  %v444_v35 = vsel %vm431_vm2, %v427_v30, %v1421_v4  ;;  %v445_v36 = vsel %vm431_vm2, %v428_v18, %v1422_v17 }
  0xe3   : > { %v641_v5 = vpack.c.bf16 %v445_v36, %v444_v35  ;;  %v633_v2 = vsel %vm431_vm2, %v617_v37, %v1431_v15  ;;  %v634_v6 = vsel %vm431_vm2, %v618_v38, %v1432_v10 }
  0xe4   : > { %v650_v54 = vpack.c.bf16 %v634_v6, %v633_v2 }
  0xe5   : > { %1082 = vmatmul.msk.bf16.gmra.mxu1 %vm675_vm3, %v641_v5 }
  0xe6   : > { %1091 = vmatmul.msk.bf16.gmra.mxu3 %vm675_vm3, %v650_v54 }
  0xe7   : > { %v1435_v19 = vpop.permute.xlu0 %1434  ;;  %v1440_v47 = vpop.permute.xlu1 %1439 }
  0xe8   : > { %v1437_v14 = vunpack.i.h.bf16 %v1435_v19  ;;  %v1436_v44 = vunpack.i.l.bf16 %v1435_v19  ;;  %v1442_v8 = vunpack.i.h.bf16 %v1440_v47  ;;  %v1441_v13 = vunpack.i.l.bf16 %v1440_v47 }
  0xea   : > { %v430_v32 = vsel %vm414_vm1, %v2130_v53, %v1437_v14  ;;  %v429_v29 = vsel %vm414_vm1, %v2131_v27, %v1436_v44 }
  0xeb   : > { %v446_v22 = vsel %vm431_vm2, %v429_v29, %v1441_v13  ;;  %v447_v31 = vsel %vm431_vm2, %v430_v32, %v1442_v8 }
  0xec   : > { %v642_v28 = vpack.c.bf16 %v447_v31, %v446_v22 }
  0xf5   : > { %1083 = vmatmul.msk.bf16.gmra.mxu1 %vm675_vm3, %v642_v28 }
 0x122   : > { %v737_v39 = vpop.f32.mrf.mxu0 }
 0x123   : > { %v738_v12 = vadd.f32 %v1979_v61, %v737_v39 }
 0x125   : > { %v817_v17 = vmax.f32 %v738_v12, 0.0 }
 0x128   : > { %v777_v49 = vpop.f32.mrf.mxu2 }
 0x129   : > { %v778_v59 = vadd.f32 %v1979_v61, %v777_v49 }
 0x12a   : > { %v739_v51 = vpop.f32.mrf.mxu0 }
 0x12b   : > { %v740_v56 = vadd.f32 %v1979_v61, %v739_v51  ;;  %v833_v63 = vmax.f32 %v778_v59, 0.0 }
 0x12d   : > { %v818_v0 = vmax.f32 %v740_v56, 0.0 }
 0x12f   : > { %v849_v36 = vadd.f32 %v818_v0, %v817_v17 }
 0x130   : > { %v779_v52 = vpop.f32.mrf.mxu2  ;;  %v797_v58 = vpop.f32.mrf.mxu3 }
 0x131   : > { %v780_v57 = vadd.f32 %v1979_v61, %v779_v52  ;;  %v798_v27 = vadd.f32 %v1979_v61, %v797_v58 }
 0x132   : > { %v742_v40 = vpop.f32.mrf.mxu0 }
 0x133   : > { %v1972_v46 = vpop.f32.mrf.mxu1  ;;  %v834_v62 = vmax.f32 %v780_v57, 0.0  ;;  %v743_v7 = vadd.f32 %v1979_v61, %v742_v40 }
 0x135   : > { %v870_v33 = vadd.f32 %v834_v62, %v833_v63  ;;  %v819_v4 = vmax.f32 %v743_v7, 0.0 }
 0x137   : > { %v850_v19 = vadd.f32 %v849_v36, %v819_v4 }
 0x138   : > { %v782_v45 = vpop.f32.mrf.mxu2  ;;  %v799_v48 = vpop.f32.mrf.mxu3 }
 0x139   : > { %v783_v25 = vadd.f32 %v1979_v61, %v782_v45  ;;  %v800_v51 = vadd.f32 %v1979_v61, %v799_v48 }
 0x13a   : > { %v744_v24 = vpop.f32.mrf.mxu0 }
 0x13b   : > { %v1974_v20 = vpop.f32.mrf.mxu1  ;;  %v835_v11 = vmax.f32 %v783_v25, 0.0  ;;  %v745_v18 = vadd.f32 %v1979_v61, %v744_v24  ;;  %v842_v25 = vmax.f32 %v800_v51, 0.0 }
 0x13c   : > { %v760_v57 = vadd.f32 %v1979_v61, %v1974_v20 }
 0x13d   : > { %v871_v38 = vadd.f32 %v870_v33, %v835_v11  ;;  %v820_v5 = vmax.f32 %v745_v18, 0.0 }
 0x13e   : > { %v826_v11 = vmax.f32 %v760_v57, 0.0  ;;  %v891_v57 = vld [vmem:[#allocation2] sm:$0x3] }
 0x13f   : > { %v851_v13 = vadd.f32 %v850_v19, %v820_v5 }
 0x140   : > { %v784_v50 = vpop.f32.mrf.mxu2 }
 0x141   : > { %v785_v60 = vadd.f32 %v1979_v61, %v784_v50  ;;  %v758_v50 = vadd.f32 %v1979_v61, %v1972_v46 }
 0x143   : > { %v836_v34 = vmax.f32 %v785_v60, 0.0  ;;  %v825_v62 = vmax.f32 %v758_v50, 0.0 }
 0x145   : > { %v872_v6 = vadd.f32 %v871_v38, %v836_v34 }
 0x148   : > { %v787_v23 = vpop.f32.mrf.mxu2  ;;  %v802_v55 = vpop.f32.mrf.mxu3 }
 0x149   : > { %v788_v9 = vadd.f32 %v1979_v61, %v787_v23  ;;  %v803_v58 = vadd.f32 %v1979_v61, %v802_v55 }
 0x14a   : > { %v747_v43 = vpop.f32.mrf.mxu0  ;;  %v1981_v41 = vpop.f32.mrf.mxu1 }
 0x14b   : > { %v748_v16 = vadd.f32 %v1979_v61, %v747_v43  ;;  %v837_v3 = vmax.f32 %v788_v9, 0.0  ;;  %v841_v43 = vmax.f32 %v798_v27, 0.0  ;;  %v763_v46 = vadd.f32 %v1979_v61, %v1981_v41 }
 0x14c   : > { %v843_v12 = vmax.f32 %v803_v58, 0.0 }
 0x14d   : > { %v821_v47 = vmax.f32 %v748_v16, 0.0  ;;  %v873_v44 = vadd.f32 %v872_v6, %v837_v3  ;;  %v827_v34 = vmax.f32 %v763_v46, 0.0 }
 0x14f   : > { %v852_v28 = vadd.f32 %v851_v13, %v821_v47 }
 0x150   : > { %v789_v42 = vpop.f32.mrf.mxu2  ;;  %v804_v26 = vpop.f32.mrf.mxu3 }
 0x151   : > { %v790_v10 = vadd.f32 %v1979_v61, %v789_v42  ;;  %v805_v48 = vadd.f32 %v1979_v61, %v804_v26 }
 0x152   : > { %v749_v21 = vpop.f32.mrf.mxu0  ;;  %v764_v1 = vpop.f32.mrf.mxu1 }
 0x153   : > { %v750_v2 = vadd.f32 %v1979_v61, %v749_v21  ;;  %v838_v54 = vmax.f32 %v790_v10, 0.0  ;;  %v765_v9 = vadd.f32 %v1979_v61, %v764_v1  ;;  %v844_v18 = vmax.f32 %v805_v48, 0.0 }
 0x155   : > { %v822_v53 = vmax.f32 %v750_v2, 0.0  ;;  %v874_v29 = vadd.f32 %v873_v44, %v838_v54  ;;  %v828_v4 = vmax.f32 %v765_v9, 0.0 }
 0x157   : > { %v853_v24 = vadd.f32 %v852_v28, %v822_v53 }
 0x158   : > { %v792_v30 = vpop.f32.mrf.mxu2 }
 0x159   : > { %v807_v15 = vpop.f32.mrf.mxu3  ;;  %v793_v37 = vadd.f32 %v1979_v61, %v792_v30 }
 0x15a   : > { %v808_v7 = vadd.f32 %v1979_v61, %v807_v15 }
 0x15b   : > { %v752_v35 = vpop.f32.mrf.mxu0  ;;  %v839_v8 = vmax.f32 %v793_v37, 0.0 }
 0x15c   : > { %v753_v14 = vadd.f32 %v1979_v61, %v752_v35  ;;  %v845_v41 = vmax.f32 %v808_v7, 0.0 }
 0x15d   : > { %v875_v52 = vadd.f32 %v874_v29, %v839_v8 }
 0x15e   : > { %v823_v39 = vmax.f32 %v753_v14, 0.0 }
 0x160   : > { %v794_v32 = vpop.f32.mrf.mxu2  ;;  %v854_v21 = vadd.f32 %v853_v24, %v823_v39 }
 0x161   : > { %v795_v22 = vadd.f32 %v1979_v61, %v794_v32  ;;  %v809_v31 = vpop.f32.mrf.mxu3 }
 0x162   : > { %v767_v49 = vpop.f32.mrf.mxu1  ;;  %v810_v30 = vadd.f32 %v1979_v61, %v809_v31 }
 0x163   : > { %v840_v40 = vmax.f32 %v795_v22, 0.0  ;;  %v754_v45 = vpop.f32.mrf.mxu0  ;;  %v768_v3 = vadd.f32 %v1979_v61, %v767_v49 }
 0x164   : > { %v755_v23 = vadd.f32 %v1979_v61, %v754_v45  ;;  %v846_v15 = vmax.f32 %v810_v30, 0.0 }
 0x165   : > { %v876_v42 = vadd.f32 %v875_v52, %v840_v40  ;;  %v829_v6 = vmax.f32 %v768_v3, 0.0 }
 0x166   : > { %v824_v59 = vmax.f32 %v755_v23, 0.0 }
 0x167   : > { %v877_v56 = vadd.f32 %v876_v42, %v841_v43 }
 0x168   : > { %v855_v60 = vadd.f32 %v854_v21, %v824_v59 }
 0x169   : > { %v878_v63 = vadd.f32 %v877_v56, %v842_v25  ;;  %v812_v55 = vpop.f32.mrf.mxu3 }
 0x16a   : > { %v856_v20 = vadd.f32 %v855_v60, %v825_v62  ;;  %v769_v0 = vpop.f32.mrf.mxu1  ;;  %v813_v33 = vadd.f32 %v1979_v61, %v812_v55 }
 0x16b   : > { %v879_v26 = vadd.f32 %v878_v63, %v843_v12  ;;  %v770_v19 = vadd.f32 %v1979_v61, %v769_v0 }
 0x16c   : > { %v857_v10 = vadd.f32 %v856_v20, %v826_v11  ;;  %v847_v37 = vmax.f32 %v813_v33, 0.0 }
 0x16d   : > { %v880_v17 = vadd.f32 %v879_v26, %v844_v18  ;;  %v830_v13 = vmax.f32 %v770_v19, 0.0 }
 0x16e   : > { %v858_v16 = vadd.f32 %v857_v10, %v827_v34 }
 0x16f   : > { %v881_v38 = vadd.f32 %v880_v17, %v845_v41 }
 0x170   : > { %v859_v35 = vadd.f32 %v858_v16, %v828_v4 }
 0x171   : > { %v882_v1 = vadd.f32 %v881_v38, %v846_v15  ;;  %v814_v36 = vpop.f32.mrf.mxu3 }
 0x172   : > { %v815_v5 = vadd.f32 %v1979_v61, %v814_v36  ;;  %v772_v2 = vpop.f32.mrf.mxu1  ;;  %v860_v14 = vadd.f32 %v859_v35, %v829_v6 }
 0x173   : > { %v883_v54 = vadd.f32 %v882_v1, %v847_v37  ;;  %v773_v44 = vadd.f32 %v1979_v61, %v772_v2 }
 0x174   : > { %v848_v47 = vmax.f32 %v815_v5, 0.0  ;;  %v861_v32 = vadd.f32 %v860_v14, %v830_v13 }
 0x175   : > { %v831_v27 = vmax.f32 %v773_v44, 0.0 }
 0x176   : > { %v884_v8 = vadd.f32 %v883_v54, %v848_v47 }
 0x177   : > { %v862_v28 = vadd.f32 %v861_v32, %v831_v27 }
 0x178   : > { %v885_v53 = vrot.slane %v884_v8, 4 }
 0x17a   : > { %v774_v29 = vpop.f32.mrf.mxu1  ;;  %v886_v22 = vadd.f32 %v885_v53, %v884_v8 }
 0x17b   : > { %v775_v31 = vadd.f32 %v1979_v61, %v774_v29 }
 0x17c   : > { %v887_v49 = vrot.slane %v886_v22, 2 }
 0x17d   : > { %v832_v39 = vmax.f32 %v775_v31, 0.0 }
 0x17e   : > { %v888_v40 = vadd.f32 %v887_v49, %v886_v22 }
 0x17f   : > { %v863_v51 = vadd.f32 %v862_v28, %v832_v39 }
 0x180   : > { %v889_v24 = vrot.slane %v888_v40, 1 }
 0x181   : > { %v864_v52 = vrot.slane %v863_v51, 4 }
 0x182   : > { %v890_v58 = vadd.f32 %v889_v24, %v888_v40 }
 0x183   : > { %v865_v45 = vadd.f32 %v864_v52, %v863_v51 }
 0x185   : > { %v866_v50 = vrot.slane %v865_v45, 2 }
 0x187   : > { %v867_v23 = vadd.f32 %v866_v50, %v865_v45 }
 0x189   : > { %v868_v43 = vrot.slane %v867_v23, 1 }
 0x18b   : > { %v869_v42 = vadd.f32 %v868_v43, %v867_v23 }
 0x18c   : > { %899 = sbr.rel (%p1092_p1) target bundleno = 562 (0x232), region = 48 }
 0x18d   : > { %v893_v21 = vsel %vm892_vm4, %v869_v42, %v890_v58 }
 0x18e   : > { %v894_v59 = vadd.f32 %v893_v21, %v891_v57 }
 0x190   : > { %895 = vst [vmem:[#allocation2] sm:$0x3] %v894_v59 }
 0x191   : > { %v917_v61 = vld [vmem:[%s2121_s3 + $0x78] sm:$0xff]  ;;  %v916_v25 = vld [vmem:[%s2121_s3 + $0x70] sm:$0xff]  ;;  %v915_v48 = vld [vmem:[%s2121_s3 + $0x68] sm:$0xff]  ;;  %vm942_vm5 = vcmask 25600  }
 0x192   : > { %922 = vmatpush.msra.mxu0 %v917_v61  ;;  %v914_v56 = vld [vmem:[%s2121_s3 + $0x60] sm:$0xff]  ;;  %v913_v62 = vld [vmem:[%s2121_s3 + $0x58] sm:$0xff]  ;;  %v912_v46 = vld [vmem:[%s2121_s3 + $0x50] sm:$0xff] }
 0x193   : > { %v911_v60 = vld [vmem:[%s2121_s3 + $0x48] sm:$0xff]  ;;  %v910_v12 = vld [vmem:[%s2121_s3 + $0x40] sm:$0xff]  ;;  %v909_v7 = vld [vmem:[%s2121_s3 + $0x38] sm:$0xff] }
 0x194   : > { %923 = vmatpush.msra.mxu0 %v916_v25  ;;  %v908_v63 = vld [vmem:[%s2121_s3 + $0x30] sm:$0xff]  ;;  %v907_v55 = vld [vmem:[%s2121_s3 + $0x28] sm:$0xff]  ;;  %v906_v11 = vld [vmem:[%s2121_s3 + $0x20] sm:$0xff] }
 0x195   : > { %v905_v9 = vld [vmem:[%s2121_s3 + $0x18] sm:$0xff]  ;;  %v904_v20 = vld [vmem:[%s2121_s3 + $0x10] sm:$0xff]  ;;  %v903_v18 = vld [vmem:[%s2121_s3 + $0x8] sm:$0xff] }
 0x196   : > { %924 = vmatpush.msra.mxu0 %v915_v48  ;;  %v902_v30 = vld [vmem:[%s2121_s3] sm:$0xff] }
 0x197   : > { %v900_v0 = vld [vmem:[#allocation2] sm:$0x3] }
 0x198   : > { %925 = vmatpush.msra.mxu0 %v914_v56  ;;  %v901_v26 = vmul.f32 0.00390625, %v900_v0  ;;  %v1444_v33 = vld [vmem:[%s2122_s4] ss:$0 sm:$0xff] }
 0x19a   : > { %926 = vmatpush.msra.mxu0 %v913_v62 }
 0x19c   : > { %927 = vmatpush.msra.mxu0 %v912_v46 }
 0x19e   : > { %928 = vmatpush.msra.mxu0 %v911_v60 }
 0x1a0   : > { %929 = vmatpush.msra.mxu0 %v910_v12 }
 0x1a2   : > { %930 = vmatpush.msra.mxu0 %v909_v7 }
 0x1a4   : > { %931 = vmatpush.msra.mxu0 %v908_v63 }
 0x1a6   : > { %932 = vmatpush.msra.mxu0 %v907_v55 }
 0x1a8   : > { %933 = vmatpush.msra.mxu0 %v906_v11 }
 0x1aa   : > { %934 = vmatpush.msra.mxu0 %v905_v9 }
 0x1ac   : > { %935 = vmatpush.msra.mxu0 %v904_v20 }
 0x1ae   : > { %936 = vmatpush.msra.mxu0 %v903_v18 }
 0x1b0   : > { %937 = vmatpush.msra.mxu0 %v902_v30 }
 0x1b1   : > { %938 = vmatmul.f32.vlgmr.msra.gmra.mxu0 %v901_v26 }
 0x22e   : > { %v939_v34 = vpop.f32.mrf.mxu0 }
 0x22f   : > { %v940_v10 = vadd.f32 %v1444_v33, %v939_v34 }
 0x231   : > { %943 = vst.msk [vmem:[%s242_s22] sm:$0x3] %vm942_vm5, %v940_v10 }
 0x232 PF: > { %s955_s7 = scalar_lea.hbm %s2123_s5, %s1642_s11  ;;  %s957_s8 = sshll.u32 %s242_s22, 4  ;;  %s958_s8 = int_to_ptr.vmem [resolvable:$true] %s957_s8 }
 0x233   : > { %s959_s21 = sshll.u32 %s955_s7, 4  ;;  %s945_s13 = scalar_lea.sflag [#allocation4], %s240_s10  ;;  %s960_s21 = int_to_ptr.hbm [resolvable:$true] %s959_s21 }
 0x234   : > { %s1459_s14 = sshra.s32 %s960_s21, 4  ;;  %s1465_s26 = scalar_lea.hbm %s2123_s5, 4  ;;  %s1460_s14 = int_to_ptr.hbm [resolvable:$true] %s1459_s14 }
 0x235   : > { %s1461_s15 = scalar_lea.hbm %s1460_s14, 2  ;;  %p1466_p6 = scmp.lt.s32.totalorder %s1460_s14, %s2123_s5 }
 0x236   : > { %p1462_p2 = scmp.ne.s32.totalorder %s1460_s14, %s1461_s15  ;;  %p1467_p7 = scmp.lt.s32.totalorder %s1465_s26, %s1461_s15 }
 0x238   : > { %p1463_p4 = pnand %p1462_p2, %p1621_p3  ;;  %p1468_p8 = por %p1467_p7, %p1466_p6 }
 0x23a   : > { %p1464_p5 = pneg %p1463_p4 }
 0x23c   : > { %p1469_p10 = pnand %p1468_p8, %p1464_p5 }
 0x23e   : > { %1472 = shalt.err (!%p1469_p10)
}
 0x23f   : > { %1209 = dma.vmem_to_hbm [thread:$0]  (%p1621_p3), %s958_s8, 32, %s960_s21, %s945_s13  }
 0x240 PF: > { %p1215_p11 = scmp.ge.s32.totalorder %s1539_s25, 2  ;;  %s971_s10 = sand.u32 1, %s1511_s18  }
 0x241   : > { %s972_s12 = scalar_lea.sflag [#allocation4], %s971_s10 }
 0x242   : > { %p1212_p12 = pnand %p1215_p11, %p1631_p9 }
 0x244   : > { %p1213_p13 = pneg %p1212_p12 }
 0x246   : > { %1506 = dma.done.wait (%p1213_p13), %s972_s12, 32  }
 0x247   : > { %1508 = vsyncadd (%p1213_p13), %s972_s12, 4294967264  ;;  %s18_s25 = sadd.s32 1, %s1539_s25   ;;  %s2132_s18 = smov %s1515_s19 }
 0x248   : > { %p15_p0 = scmp.ge.s32.totalorder %s18_s25, 6   ;;  %s2133_s19 = smov %s1519_s20 }
 0x249   : > { %s2134_s20 = smov %s1639_s9  ;;  %s2135_s21 = smov %s1531_s23 }
 0x24a   : > { %s2136_s22 = smov %s1535_s24  ;;  %s2137_s23 = smov %s2140_s28 }
 0x24b   : > { %s2138_s24 = smov %s2144_s29  ;;  %17 = sbr.rel (!%p15_p0) target bundleno = 5 (0x5), region = 84 }
 0x250   :  { %978 = vsyncpa [#allocation4], 1 }
 0x251   :  { %980 = vsyncpa [#allocation4 + $0x1], 1 }

</bundles_post_ra>
